<compile_context>
chip_gen: v5e
topology: v5e:2x2
jax: 0.10.0
libtpu: 0.0.40
codegen_flags: <defaults>
</compile_context>

<pallas_src>
import functools

import jax
import jax.numpy as jnp
from jax import lax
from jax.experimental import pallas as pl
from jax.experimental.pallas import tpu as pltpu

HIDDEN = 128     # fc1 output width (module spec)
HEAD_PAD = 128   # fused fc2|fc3 head, padded to one full 128-lane tile


def policy_kernel(x_ref, w1_ref, b_ref, w23_ref, out_ref, *, action_dim):
    # ---- fc1 + relu: (TM, S) @ (S, 128) on the MXU, f32 accumulation ------
    h = jnp.dot(x_ref[...], w1_ref[...], preferred_element_type=jnp.float32)
    h = jnp.maximum(h + b_ref[0:1, :], 0.0)                        # (TM, 128)

    # ---- fused fc2|fc3 head: one 128x128 MXU matmul; value in lane A ------
    z = jnp.dot(h, w23_ref[...], preferred_element_type=jnp.float32)
    z = z + b_ref[1:2, :]                                          # (TM, 128)

    lane = lax.broadcasted_iota(jnp.int32, z.shape, dimension=1)
    is_action = lane < action_dim                                  # lanes [0, A)

    # ---- softmax over action lanes only (exp(-inf)=0 zeroes pad & value) --
    logits = jnp.where(is_action, z, -jnp.inf)
    m = jnp.max(logits, axis=-1, keepdims=True)
    e = jnp.exp(logits - m)
    denom = jnp.sum(e, axis=-1, keepdims=True)
    probs = e / denom                      # exact divide: rows sum to 1

    # ---- lane-dense output slab: probs | value | zeros ---------------------
    out_ref[...] = jnp.where(lane == action_dim, z, probs).astype(out_ref.dtype)


def fuse_params(w1, b1, w2, b2, w3, b3):
    """One-time host-side fusion: W1 (S,128), [b1; b2|b3|0] (2,128), [W2|W3|0] (128,128)."""
    S, H = w1.shape
    A = w2.shape[1]
    assert H == HIDDEN and 1 <= A and A + 1 <= HEAD_PAD

    # Fused head: [W2 | W3 | zeros]  (128, 128), value column at index A.
    w23 = jnp.zeros((HIDDEN, HEAD_PAD), jnp.float32)
    w23 = w23.at[:, :A].set(w2).at[:, A:A + 1].set(w3)

    b23 = jnp.zeros((1, HEAD_PAD), jnp.float32)
    b23 = b23.at[:, :A].set(b2).at[:, A:A + 1].set(b3)

    # Stack both bias rows into one (2, 128) array -> one fewer input DMA.
    b_stack = jnp.concatenate([b1.reshape(1, HIDDEN), b23], axis=0)
    return w1.astype(jnp.float32), b_stack, w23


def _round_up(v, m):
    return ((v + m - 1) // m) * m


@functools.partial(jax.jit, static_argnames=("action_dim", "block_rows"))
def policy_forward(x, w1, b_stack, w23, *, action_dim, block_rows=512):
    B, S = x.shape

    # Row tile: multiple of 8, capped at block_rows (~85% of HBM roofline at
    # 512; per-step overhead ~0.35us), and small enough that the batch splits
    # into >=2 tiles when possible so v7x's two TensorCores both get work.
    TM = min(block_rows, max(8, _round_up(pl.cdiv(B, 2), 8)))
    Bp = _round_up(B, TM)

    xf = x.astype(jnp.float32)
    if Bp != B:                         # cheap: only S-wide zero rows
        xf = jnp.pad(xf, ((0, Bp - B), (0, 0)))

    out = pl.pallas_call(
        functools.partial(policy_kernel, action_dim=action_dim),
        out_shape=jax.ShapeDtypeStruct((Bp, HEAD_PAD), jnp.float32),
        grid=(Bp // TM,),
        in_specs=[
            pl.BlockSpec((TM, S), lambda i: (i, 0)),             # x tile (K=S, no lane pad)
            pl.BlockSpec((S, HIDDEN), lambda i: (0, 0)),         # W1 (VMEM resident)
            pl.BlockSpec((2, HIDDEN), lambda i: (0, 0)),         # [b1; b2|b3|0]
            pl.BlockSpec((HIDDEN, HEAD_PAD), lambda i: (0, 0)),  # fused [W2|W3|0]
        ],
        out_specs=pl.BlockSpec((TM, HEAD_PAD), lambda i: (i, 0)),
        compiler_params=pltpu.CompilerParams(
            dimension_semantics=("parallel",)),
    )(xf, w1, b_stack, w23)

    # Sliced inside the same jit so the narrow views fuse into consumers
    # instead of re-reading the full slab from HBM.
    action_probs = out[:B, :action_dim]
    state_values = out[:B, action_dim:action_dim + 1]
    return action_probs, state_values


def init_params(key, state_dim, action_dim, hidden=HIDDEN):
    # Deterministic init mimicking nn.Linear's U(-1/sqrt(fan_in), 1/sqrt(fan_in)).
    ks = jax.random.split(key, 6)

    def lin(kw, kb, fan_in, fan_out):
        bound = 1.0 / jnp.sqrt(fan_in)
        w = jax.random.uniform(kw, (fan_in, fan_out), jnp.float32, -bound, bound)
        b = jax.random.uniform(kb, (1, fan_out), jnp.float32, -bound, bound)
        return w, b

    w1, b1 = lin(ks[0], ks[1], state_dim, hidden)
    w2, b2 = lin(ks[2], ks[3], hidden, action_dim)
    w3, b3 = lin(ks[4], ks[5], hidden, 1)
    return w1, b1, w2, b2, w3, b3


if __name__ == "__main__":
    # Small synthetic shapes consistent with the module's forward:
    # batch=8, state_dim=32, action_dim=18 (Atari Frostbite action count).
    B, STATE_DIM, ACTION_DIM = 8, 32, 18

    key = jax.random.PRNGKey(0)
    kx, kp = jax.random.split(key)
    x = jax.random.normal(kx, (B, STATE_DIM), jnp.float32)
    w1, b1, w2, b2, w3, b3 = init_params(kp, STATE_DIM, ACTION_DIM)

    w1f, b_stack, w23 = fuse_params(w1, b1, w2, b2, w3, b3)   # once, host-side

    action_probs, state_values = policy_forward(
        x, w1f, b_stack, w23, action_dim=ACTION_DIM)
    jax.block_until_ready((action_probs, state_values))

    # Plain-JAX reference of the original module (full-precision matmuls).
    hp = lax.Precision.HIGHEST
    h_ref = jnp.maximum(jnp.dot(x, w1, precision=hp) + b1, 0.0)
    probs_ref = jax.nn.softmax(jnp.dot(h_ref, w2, precision=hp) + b2, axis=-1)
    vals_ref = jnp.dot(h_ref, w3, precision=hp) + b3

    assert action_probs.shape == (B, ACTION_DIM)
    assert state_values.shape == (B, 1)
    assert jnp.allclose(action_probs, probs_ref, atol=1e-4)
    assert jnp.allclose(state_values, vals_ref, atol=1e-4)
    assert jnp.allclose(jnp.sum(action_probs, axis=-1), 1.0, atol=1e-5)

    print("KERNEL_OK")
</pallas_src>

<mosaic_0001>
module attributes {stable_mosaic.version = 11 : i64} {
  func.func @policy_kernel(%arg0: i32, %arg1: memref<8x32xf32, #tpu.memory_space<vmem>>, %arg2: memref<32x128xf32, #tpu.memory_space<vmem>>, %arg3: memref<2x128xf32, #tpu.memory_space<vmem>>, %arg4: memref<128x128xf32, #tpu.memory_space<vmem>>, %arg5: memref<8x128xf32, #tpu.memory_space<vmem>>) attributes {dimension_semantics = [#tpu.dimension_semantics<parallel>], iteration_bounds = array<i64: 1>, scalar_prefetch = 0 : i64, scratch_operands = 0 : i64, tpu.core_type = #tpu.core_type<tc>, window_params = [{transform_indices = @transform_0, window_bounds = array<i64: 8, 32>}, {pipeline_mode = #tpu.pipeline_mode<synchronous>, transform_indices = @transform_1, window_bounds = array<i64: 32, 128>}, {pipeline_mode = #tpu.pipeline_mode<synchronous>, transform_indices = @transform_2, window_bounds = array<i64: 2, 128>}, {pipeline_mode = #tpu.pipeline_mode<synchronous>, transform_indices = @transform_3, window_bounds = array<i64: 128, 128>}, {transform_indices = @transform_4, window_bounds = array<i64: 8, 128>}]} {
    %c0 = arith.constant 0 : index
    %c0_0 = arith.constant 0 : index
    %0 = vector.load %arg1[%c0, %c0_0] : memref<8x32xf32, #tpu.memory_space<vmem>>, vector<8x32xf32>
    %c0_1 = arith.constant 0 : index
    %c0_2 = arith.constant 0 : index
    %1 = vector.load %arg2[%c0_1, %c0_2] : memref<32x128xf32, #tpu.memory_space<vmem>>, vector<32x128xf32>
    %cst = arith.constant dense<0.000000e+00> : vector<8x128xf32>
    %2 = tpu.matmul %0, %1, %cst {dimension_numbers = #tpu.dot_dimension_numbers<[1], [0], [0], [1], [0, 0, 1, 1], [], []>} : vector<8x32xf32>, vector<32x128xf32>, vector<8x128xf32> -> vector<8x128xf32>
    %c0_3 = arith.constant 0 : index
    %c0_4 = arith.constant 0 : index
    %3 = vector.load %arg3[%c0_3, %c0_4] : memref<2x128xf32, #tpu.memory_space<vmem>>, vector<1x128xf32>
    %4 = vector.broadcast %3 : vector<1x128xf32> to vector<8x128xf32>
    %5 = arith.addf %2, %4 : vector<8x128xf32>
    %cst_5 = arith.constant 0.000000e+00 : f32
    %6 = vector.broadcast %cst_5 : f32 to vector<8x128xf32>
    %7 = arith.maximumf %5, %6 : vector<8x128xf32>
    %c0_6 = arith.constant 0 : index
    %c0_7 = arith.constant 0 : index
    %8 = vector.load %arg4[%c0_6, %c0_7] : memref<128x128xf32, #tpu.memory_space<vmem>>, vector<128x128xf32>
    %cst_8 = arith.constant dense<0.000000e+00> : vector<8x128xf32>
    %9 = tpu.matmul %7, %8, %cst_8 {dimension_numbers = #tpu.dot_dimension_numbers<[1], [0], [0], [1], [0, 0, 1, 1], [], []>} : vector<8x128xf32>, vector<128x128xf32>, vector<8x128xf32> -> vector<8x128xf32>
    %c1 = arith.constant 1 : index
    %c0_9 = arith.constant 0 : index
    %10 = vector.load %arg3[%c1, %c0_9] : memref<2x128xf32, #tpu.memory_space<vmem>>, vector<1x128xf32>
    %11 = vector.broadcast %10 : vector<1x128xf32> to vector<8x128xf32>
    %12 = arith.addf %9, %11 : vector<8x128xf32>
    %13 = tpu.iota {dimensions = array<i32: 1>} : vector<8x128xi32>
    %c18_i32 = arith.constant 18 : i32
    %14 = vector.broadcast %c18_i32 : i32 to vector<8x128xi32>
    %15 = arith.cmpi slt, %13, %14 : vector<8x128xi32>
    %cst_10 = arith.constant 0xFF800000 : f32
    %16 = vector.broadcast %cst_10 : f32 to vector<8x128xf32>
    %17 = arith.select %15, %12, %16 : vector<8x128xi1>, vector<8x128xf32>
    %cst_11 = arith.constant dense<0xFF800000> : vector<8xf32>
    %18 = vector.multi_reduction <maximumf>, %17, %cst_11 [1] : vector<8x128xf32> to vector<8xf32>
    %19 = vector.shape_cast %18 : vector<8xf32> to vector<8x1xf32>
    %20 = vector.broadcast %19 : vector<8x1xf32> to vector<8x128xf32>
    %21 = arith.subf %17, %20 : vector<8x128xf32>
    %22 = math.exp %21 : vector<8x128xf32>
    %cst_12 = arith.constant dense<0.000000e+00> : vector<8xf32>
    %23 = vector.multi_reduction <add>, %22, %cst_12 [1] : vector<8x128xf32> to vector<8xf32>
    %24 = vector.shape_cast %23 : vector<8xf32> to vector<8x1xf32>
    %25 = vector.broadcast %24 : vector<8x1xf32> to vector<8x128xf32>
    %26 = arith.divf %22, %25 : vector<8x128xf32>
    %c18_i32_13 = arith.constant 18 : i32
    %27 = vector.broadcast %c18_i32_13 : i32 to vector<8x128xi32>
    %28 = arith.cmpi eq, %13, %27 : vector<8x128xi32>
    %29 = arith.select %28, %12, %26 : vector<8x128xi1>, vector<8x128xf32>
    %c0_14 = arith.constant 0 : index
    %c0_15 = arith.constant 0 : index
    %30 = vector.load %arg5[%c0_14, %c0_15] : memref<8x128xf32, #tpu.memory_space<vmem>>, vector<8x128xf32>
    tpu.vector_store %arg5[%c0_14, %c0_15], %29 {strides = array<i32>} : memref<8x128xf32, #tpu.memory_space<vmem>>, vector<8x128xf32>,
    return
  }
  func.func @transform_0(%arg0: i32) -> (i32, i32) {
    %c0_i32 = arith.constant 0 : i32
    %c0_i32_0 = arith.constant 0 : i32
    return %arg0, %c0_i32 : i32, i32
  }
  func.func @transform_1(%arg0: i32) -> (i32, i32) {
    %c0_i32 = arith.constant 0 : i32
    %c0_i32_0 = arith.constant 0 : i32
    %c0_i32_1 = arith.constant 0 : i32
    return %c0_i32, %c0_i32_0 : i32, i32
  }
  func.func @transform_2(%arg0: i32) -> (i32, i32) {
    %c0_i32 = arith.constant 0 : i32
    %c0_i32_0 = arith.constant 0 : i32
    %c0_i32_1 = arith.constant 0 : i32
    return %c0_i32, %c0_i32_0 : i32, i32
  }
  func.func @transform_3(%arg0: i32) -> (i32, i32) {
    %c0_i32 = arith.constant 0 : i32
    %c0_i32_0 = arith.constant 0 : i32
    %c0_i32_1 = arith.constant 0 : i32
    return %c0_i32, %c0_i32_0 : i32, i32
  }
  func.func @transform_4(%arg0: i32) -> (i32, i32) {
    %c0_i32 = arith.constant 0 : i32
    %c0_i32_0 = arith.constant 0 : i32
    return %arg0, %c0_i32 : i32, i32
  }
}

</mosaic_0001>

<bundles_post_ra>
// kernel: policy_forward.1
= control target key start
LH: loop header
LB: loop body
LE: loop exit
PB: predicated region body
PF: predicated region fallthrough
CT: control target
= control target key end

     0   :  { %9 = vsyncpa [#allocation3], 0  ;;  %s343_s0 = inlined_call_operand.hbm [shape: f32[8,32], index: 0, kind: input, shape index: {}]   ;;  %s344_s1 = inlined_call_operand.hbm [shape: f32[32,128], index: 1, kind: input, shape index: {}]   ;;  %s345_s2 = inlined_call_operand.hbm [shape: f32[2,128], index: 2, kind: input, shape index: {}]   ;;  %s346_s3 = inlined_call_operand.hbm [shape: f32[128,128], index: 3, kind: input, shape index: {}]   ;;  %s347_s4 = inlined_call_operand.vmem [shape: f32[8,128], index: 4, kind: output, shape index: {}]  }
   0x1   :  { %10 = vsyncpa [#allocation5], 0  ;;  %s27_s17 = sshll.u32 %s344_s1, 4  ;;  %s28_s17 = int_to_ptr.hbm [resolvable:$true] %s27_s17 }
   0x2   :  { %11 = vsyncpa [#allocation8], 0  ;;  %s297_s18 = smov [#allocation4]   ;;  %s17_s22 = sshll.u32 %s343_s0, 4  ;;  %s18_s22 = int_to_ptr.hbm [resolvable:$true] %s17_s22 }
   0x3   :  { %s29_s19 = sshll.u32 %s297_s18, 4  ;;  %s298_s23 = smov 128   ;;  %s30_s19 = int_to_ptr.vmem [resolvable:$true] %s29_s19 }
   0x4   :  { %s299_s24 = smov 8   ;;  %s300_s25 = smov [#allocation2]  }
   0x5   :  { %35 = dma.hbm_to_vmem [thread:$0]  %s28_s17, 512, %s30_s19, [#allocation5], %s298_s23, %s298_s23, %s299_s24  }
   0x6   :  { %s19_s26 = sshll.u32 %s300_s25, 4  ;;  %s41_s29 = sshll.u32 %s345_s2, 4  ;;  %s20_s26 = int_to_ptr.vmem [resolvable:$true] %s19_s26  ;;  %s42_s29 = int_to_ptr.hbm [resolvable:$true] %s41_s29 }
   0x7   :  { %22 = dma.hbm_to_vmem [thread:$0]  %s18_s22, 128, %s20_s26, [#allocation3]  }
   0x8   :  { %s51_s5 = sshll.u32 %s346_s3, 4  ;;  %s301_s6 = smov [#allocation6]   ;;  %s52_s5 = int_to_ptr.hbm [resolvable:$true] %s51_s5 }
   0x9   :  { %s43_s7 = sshll.u32 %s301_s6, 4  ;;  %s302_s0 = smov [#allocation7]   ;;  %s44_s7 = int_to_ptr.vmem [resolvable:$true] %s43_s7 }
   0xa   :  { %46 = dma.hbm_to_vmem [thread:$0]  %s42_s29, 32, %s44_s7, [#allocation5]  }
   0xb   :  { %s53_s8 = sshll.u32 %s302_s0, 4  ;;  %s54_s8 = int_to_ptr.vmem [resolvable:$true] %s53_s8 }
   0xc   :  { %59 = dma.hbm_to_vmem [thread:$0]  %s52_s5, 2048, %s54_s8, [#allocation8], %s298_s23, %s298_s23, %s299_s24  }
   0xd   :  { %291 = dma.done.wait [#allocation3], 128  }
   0xe   :  { %292 = vsyncadd [#allocation3], 4294967168 }
   0xf   :  { %293 = dma.done.wait [#allocation5], 544  }
  0x10   :  { %294 = vsyncadd [#allocation5], 4294966752 }
  0x11   :  { %295 = dma.done.wait [#allocation8], 2048  }
  0x12   :  { %296 = vsyncadd [#allocation8], 4294965248  ;;  %v80_v0 = vld [vmem:[#allocation4 + $0x18] sm:$0xff]  ;;  %v79_v1 = vld [vmem:[#allocation4 + $0x10] sm:$0xff]  ;;  %vm83_vm0 = vcmask 261120   ;;  %v146_v25 = vlaneseq }
  0x13   :  { %99 = vmatpush.msra.mxu0 %v80_v0  ;;  %v123_v2 = vld [vmem:[#allocation7 + $0x78] sm:$0xff]  ;;  %v78_v3 = vld [vmem:[#allocation4 + $0x8] sm:$0xff]  ;;  %v122_v4 = vld [vmem:[#allocation7 + $0x70] sm:$0xff] }
  0x14   :  { %126 = vmatpush.msra.mxu1 %v123_v2  ;;  %v121_v5 = vld [vmem:[#allocation7 + $0x68] sm:$0xff]  ;;  %v77_v6 = vld [vmem:[#allocation4] sm:$0xff]  ;;  %v76_v7 = vld [vmem:[#allocation2] sm:$0xff]  ;;  %v147_v26 = vand.u32 127, %v146_v25 }
  0x15   :  { %100 = vmatpush.msra.mxu0 %v79_v1  ;;  %v120_v8 = vld [vmem:[#allocation7 + $0x60] sm:$0xff]  ;;  %v119_v9 = vld [vmem:[#allocation7 + $0x58] sm:$0xff]  ;;  %v118_v10 = vld [vmem:[#allocation7 + $0x50] sm:$0xff] }
  0x16   :  { %127 = vmatpush.msra.mxu1 %v122_v4  ;;  %v117_v11 = vld [vmem:[#allocation7 + $0x48] sm:$0xff]  ;;  %v116_v12 = vld [vmem:[#allocation7 + $0x40] sm:$0xff]  ;;  %v115_v13 = vld [vmem:[#allocation7 + $0x38] sm:$0xff]  ;;  %vm148_vm1 = vcmp.lt.s32.totalorder %v147_v26, 18  ;;  %vm172_vm6 = vcmp.eq.s32.totalorder %v147_v26, 18 }
  0x17   :  { %101 = vmatpush.msra.mxu0 %v78_v3  ;;  %v114_v14 = vld [vmem:[#allocation7 + $0x30] sm:$0xff]  ;;  %v113_v15 = vld [vmem:[#allocation7 + $0x28] sm:$0xff]  ;;  %v112_v16 = vld [vmem:[#allocation7 + $0x20] sm:$0xff] }
  0x18   :  { %128 = vmatpush.msra.mxu1 %v121_v5  ;;  %v111_v17 = vld [vmem:[#allocation7 + $0x18] sm:$0xff]  ;;  %v110_v18 = vld [vmem:[#allocation7 + $0x10] sm:$0xff]  ;;  %v109_v19 = vld [vmem:[#allocation7 + $0x8] sm:$0xff] }
  0x19   :  { %102 = vmatpush.msra.mxu0 %v77_v6  ;;  %v108_v20 = vld [vmem:[#allocation7] sm:$0xff]  ;;  %v189_v21 = vld [vmem:[#allocation6] ss:$0 sm:$0xff]  ;;  %v190_v27 = vld [vmem:[#allocation6 + $0x1] ss:$0 sm:$0xff] }
  0x1a   :  { %182 = vmatmul.msk.f32.vlgmr.msra.gmra.mxu0 %vm83_vm0, %v76_v7  ;;  %129 = vmatpush.msra.mxu1 %v120_v8 }
  0x1c   :  { %130 = vmatpush.msra.mxu1 %v119_v9 }
  0x1e   :  { %131 = vmatpush.msra.mxu1 %v118_v10 }
  0x20   :  { %132 = vmatpush.msra.mxu1 %v117_v11 }
  0x22   :  { %133 = vmatpush.msra.mxu1 %v116_v12 }
  0x24   :  { %134 = vmatpush.msra.mxu1 %v115_v13 }
  0x26   :  { %135 = vmatpush.msra.mxu1 %v114_v14 }
  0x28   :  { %136 = vmatpush.msra.mxu1 %v113_v15 }
  0x2a   :  { %137 = vmatpush.msra.mxu1 %v112_v16 }
  0x2c   :  { %138 = vmatpush.msra.mxu1 %v111_v17 }
  0x2e   :  { %139 = vmatpush.msra.mxu1 %v110_v18 }
  0x30   :  { %140 = vmatpush.msra.mxu1 %v109_v19 }
  0x32   :  { %141 = vmatpush.msra.mxu1 %v108_v20 }
  0x97   :  { %v104_v22 = vpop.f32.mrf.mxu0 }
  0x98   :  { %v105_v23 = vadd.f32 %v189_v21, %v104_v22 }
  0x9a   :  { %v107_v24 = vmax.f32 %v105_v23, 0.0 }
  0x9c   :  { %142 = vmatmul.f32.vlgmr.msra.gmra.mxu1 %v107_v24 }
 0x119   :  { %v143_v28 = vpop.f32.mrf.mxu1 }
 0x11a   :  { %v144_v29 = vadd.f32 %v190_v27, %v143_v28 }
 0x11c   :  { %v149_v30 = vsel %vm148_vm1, %v144_v29, -inf }
 0x11d   :  { %150 = vmax.xlane.f32.xlu0 %v149_v30 }
 0x190   :  { %v151_v31 = vpop.xlane.xlu0 %150 }
 0x191   :  { %v152_v32 = vsub.f32 %v149_v30, %v151_v31 }
 0x193   :  { %v153_v33 = vmul.f32 1.442695, %v152_v32 }
 0x195   :  { %191 = vpow2.f32 %v153_v33 }
 0x19b   :  { %v192_v34 = vpop.eup %191 }
 0x19c   :  { %155 = vadd.xlane.f32.xlu0 %v192_v34 }
 0x20f   :  { %v156_v35 = vpop.xlane.xlu0 %155 }
 0x210   :  { %193 = vrcp.f32 %v156_v35  ;;  %v168_v39 = vand.u32 2147483648, %v156_v35  ;;  %v166_v41 = vand.u32 2147483647, %v156_v35  ;;  %vm162_vm3 = vweird.f32 %v156_v35 }
 0x212   :  { %v169_v43 = vor.u32 1.1754944e-38, %v168_v39  ;;  %vm167_vm5 = vcmp.eq.f32.partialorder %v166_v41, 8.507059e+37 }
 0x216   :  { %v194_v36 = vpop.eup %193 }
 0x217   :  { %v158_v37 = vmul.f32 %v194_v36, %v156_v35  ;;  %vm163_vm2 = vweird.f32 %v194_v36 }
 0x218   :  { %vm164_vm4 = vmor %vm162_vm3, %vm163_vm2 }
 0x219   :  { %v159_v38 = vsub.f32 1.0, %v158_v37 }
 0x21b   :  { %v160_v40 = vmul.f32 %v194_v36, %v159_v38 }
 0x21d   :  { %v161_v42 = vadd.f32 %v194_v36, %v160_v40 }
 0x21f   :  { %v165_v44 = vsel %vm164_vm4, %v194_v36, %v161_v42 }
 0x220   :  { %v170_v45 = vsel %vm167_vm5, %v169_v43, %v165_v44 }
 0x221   :  { %v171_v46 = vmul.f32 %v192_v34, %v170_v45 }
 0x223   :  { %v173_v47 = vsel %vm172_vm6, %v144_v29, %v171_v46 }
 0x224   :  { %174 = vst [vmem:[%s347_s4] sm:$0xff] %v173_v47 }
 0x225   :  { %179 = vsyncpa [#allocation3], 1 }
 0x226   :  { %180 = vsyncpa [#allocation5], 1 }
 0x227   :  { %181 = vsyncpa [#allocation8], 1 }

</bundles_post_ra>
